<compile_context>
chip_gen: v7x
topology: tpu7x:2x2x1
jax: 0.10.0
libtpu: 0.0.40
codegen_flags: <defaults>
</compile_context>

<pallas_src>
import jax
import jax.numpy as jnp
from jax import lax
from jax.experimental import pallas as pl
from jax.experimental.pallas import tpu as pltpu


def _gather_tokens_kernel(idx_ref, x_ref, o_ref):
    """One-hot MXU gather: o[0, c, :] = x[0, idx[c], :] for the current chunk.

    idx_ref : VMEM (1, 1, CHUNK) int32  -- keep-indices for this output chunk
    x_ref   : VMEM (1, seq, dim)        -- full token slab of batch b (VMEM-
                                           resident across this b's chunks)
    o_ref   : VMEM (1, CHUNK, dim)
    """
    seq = x_ref.shape[1]
    chunk = o_ref.shape[1]

    idx_row = idx_ref[0, :, :]                                     # (1, chunk)
    token_iota = lax.broadcasted_iota(jnp.int32, (seq, chunk), 0)  # (seq, chunk)
    # Lane-aligned broadcast compare (VPU only, no cross-lane relayout):
    # one-hot selection matrix, exactly one 1.0 per output column.
    onehot_t = (token_iota == idx_row).astype(x_ref.dtype)         # (seq, chunk)

    # Dense gather as a single MXU matmul contracting over seq:
    #   out[c, d] = sum_s onehot_t[s, c] * x[s, d]
    # With 0/1 weights and exactly one nonzero per output row this is a copy.
    # HIGHEST precision keeps f32 inputs exact (multi-pass bf16 decomposition);
    # bf16 inputs are natively exact on the MXU.
    precision = (lax.Precision.HIGHEST if x_ref.dtype == jnp.float32
                 else lax.Precision.DEFAULT)
    gathered = lax.dot_general(
        onehot_t, x_ref[0, :, :],
        dimension_numbers=(((0,), (0,)), ((), ())),
        preferred_element_type=jnp.float32,
        precision=precision,
    )                                                              # (chunk, dim)
    o_ref[0, :, :] = gathered.astype(o_ref.dtype)


def gather_tokens(x: jax.Array, idx: jax.Array, *, chunk_rows: int = 128) -> jax.Array:
    """out[b, k, :] = x[b, idx[b, k], :] via a Pallas TPU one-hot MXU gather."""
    batch, seq, dim = x.shape
    assert idx.shape[0] == batch
    num_out = idx.shape[1]
    idx = idx.astype(jnp.int32)

    # Chunk the output-token axis so the grid has enough steps to hide the
    # per-batch slab DMA (and so small-batch cases still fill both v7x TCs).
    if num_out <= chunk_rows:
        chunk = num_out                    # single chunk: block == full dim
        num_out_padded = num_out
    else:
        chunk = chunk_rows                 # multiple of (8, 128): dense tiles
        num_out_padded = pl.cdiv(num_out, chunk) * chunk
        # Padding indices gather token 0; padded rows are sliced off below.
        idx = jnp.pad(idx, ((0, 0), (0, num_out_padded - num_out)))
    num_chunks = num_out_padded // chunk
    idx3 = idx.reshape(batch, 1, num_out_padded)

    itemsize = jnp.dtype(x.dtype).itemsize
    cost = pl.CostEstimate(
        flops=2 * batch * num_out_padded * seq * dim,
        transcendentals=0,
        bytes_accessed=batch * (seq + num_out_padded) * dim * itemsize
        + idx3.size * 4,
    )

    out = pl.pallas_call(
        _gather_tokens_kernel,
        out_shape=jax.ShapeDtypeStruct((batch, num_out_padded, dim), x.dtype),
        grid_spec=pltpu.PrefetchScalarGridSpec(
            num_scalar_prefetch=0,
            grid=(batch, num_chunks),
            in_specs=[
                # Keep-index vector for this (batch, chunk) step (tiny, VMEM).
                pl.BlockSpec((1, 1, chunk), lambda b, c: (b, 0, c)),
                # Full token slab of batch b; block index constant in c, so the
                # slab is DMA'd once per batch element and reused per chunk.
                pl.BlockSpec((1, seq, dim), lambda b, c: (b, 0, 0)),
            ],
            out_specs=pl.BlockSpec((1, chunk, dim), lambda b, c: (b, c, 0)),
        ),
        compiler_params=pltpu.CompilerParams(
            # batch: embarrassingly parallel (megacore / v7x 2-TC sharding);
            # chunk: "arbitrary" so the resident slab block is not re-DMA'd.
            dimension_semantics=("parallel", "arbitrary"),
            vmem_limit_bytes=32 * 1024 * 1024,
        ),
        cost_estimate=cost,
    )(idx3, x)

    if num_out_padded != num_out:
        out = out[:, :num_out, :]
    return out


def _keep_indices(key, batch, num_tokens, prob, exclude_first_token):
    """Random per-batch keep indices into the ORIGINAL sequence (incl. cls)."""
    keep_prob = 1.0 - prob
    num_keep = max(1, int(num_tokens * keep_prob))
    rand = jax.random.normal(key, (batch, num_tokens))
    _, keep = lax.top_k(rand, num_keep)     # random subset, like torch .topk on randn
    keep = keep.astype(jnp.int32)
    if exclude_first_token:
        # Indices were computed on x[:, 1:]; shift by 1 and prepend the cls
        # token's index so a single gather yields cls + kept patches.
        cls_idx = jnp.zeros((batch, 1), dtype=jnp.int32)
        keep = jnp.concatenate([cls_idx, keep + 1], axis=1)
    return keep


def patch_dropout(x, key, prob, *, exclude_first_token=True, training=True):
    """PatchDropout forward: randomly keep a subset of (non-cls) tokens."""
    assert 0.0 <= prob < 1.0
    if (not training) or prob == 0.0:
        return x                            # passthrough, no kernel launch
    batch, seq, dim = x.shape
    num_tokens = seq - 1 if exclude_first_token else seq
    idx = _keep_indices(key, batch, num_tokens, prob, exclude_first_token)
    return gather_tokens(x, idx)


if __name__ == "__main__":
    root = jax.random.PRNGKey(0)
    kx, kdrop, kx2, kdrop2 = jax.random.split(root, 4)

    # --- Small ViT-like case: batch=2, seq=8 (cls + 7 patches), dim=128 ------
    batch, seq, dim = 2, 8, 128
    prob = 0.25
    x = jax.random.normal(kx, (batch, seq, dim), dtype=jnp.float32)
    y = patch_dropout(x, kdrop, prob, exclude_first_token=True, training=True)
    jax.block_until_ready(y)

    idx = _keep_indices(kdrop, batch, seq - 1, prob, True)
    y_ref = x[jnp.arange(batch)[:, None], idx]       # plain-JAX gather reference
    assert y.shape == y_ref.shape, (y.shape, y_ref.shape)
    # One-hot gather is bit-exact with HIGHEST precision; tolerance is a
    # defensive margin, still orders of magnitude below a wrong-row error.
    assert jnp.allclose(y, y_ref, atol=2e-2, rtol=2e-2), "small-case mismatch"

    # --- Multi-chunk + padding path: num_out > 128 and not a multiple of 128 -
    batch2, seq2, dim2 = 2, 512, 128
    prob2 = 0.3
    x2 = jax.random.normal(kx2, (batch2, seq2, dim2), dtype=jnp.float32)
    y2 = patch_dropout(x2, kdrop2, prob2, exclude_first_token=True, training=True)
    jax.block_until_ready(y2)
    idx2 = _keep_indices(kdrop2, batch2, seq2 - 1, prob2, True)
    y2_ref = x2[jnp.arange(batch2)[:, None], idx2]
    assert y2.shape == y2_ref.shape, (y2.shape, y2_ref.shape)
    assert jnp.allclose(y2, y2_ref, atol=2e-2, rtol=2e-2), "chunked-case mismatch"

    # --- Eval-mode / prob=0 passthrough --------------------------------------
    y_eval = patch_dropout(x, kdrop, prob, training=False)
    assert jnp.array_equal(y_eval, x)

    print("KERNEL_OK")
</pallas_src>

<mosaic_0001>
module attributes {stable_mosaic.version = 11 : i64} {
  func.func @_gather_tokens_kernel(%arg0: i32, %arg1: i32, %arg2: memref<1x1x6xi32, #tpu.memory_space<vmem>>, %arg3: memref<1x8x128xf32, #tpu.memory_space<vmem>>, %arg4: memref<1x6x128xf32, #tpu.memory_space<vmem>>) attributes {dimension_semantics = [#tpu.dimension_semantics<parallel>, #tpu.dimension_semantics<arbitrary>], iteration_bounds = array<i64: 2, 1>, scalar_prefetch = 0 : i64, scratch_operands = 0 : i64, tpu.core_type = #tpu.core_type<tc>, window_params = [{transform_indices = @transform_0, window_bounds = array<i64: 1, 1, 6>}, {transform_indices = @transform_1, window_bounds = array<i64: 1, 8, 128>}, {transform_indices = @transform_2, window_bounds = array<i64: 1, 6, 128>}]} {
    %c0 = arith.constant 0 : index
    %c0_0 = arith.constant 0 : index
    %c0_1 = arith.constant 0 : index
    %0 = vector.load %arg2[%c0, %c0_0, %c0_1] : memref<1x1x6xi32, #tpu.memory_space<vmem>>, vector<1x1x6xi32>
    %1 = vector.shape_cast %0 : vector<1x1x6xi32> to vector<1x6xi32>
    %2 = tpu.iota {dimensions = array<i32: 0>} : vector<8x6xi32>
    %3 = vector.broadcast %1 : vector<1x6xi32> to vector<8x6xi32>
    %4 = arith.cmpi eq, %2, %3 : vector<8x6xi32>
    %5 = arith.extui %4 : vector<8x6xi1> to vector<8x6xi32>
    %6 = arith.sitofp %5 : vector<8x6xi32> to vector<8x6xf32>
    %c0_2 = arith.constant 0 : index
    %c0_3 = arith.constant 0 : index
    %c0_4 = arith.constant 0 : index
    %7 = vector.load %arg3[%c0_2, %c0_3, %c0_4] : memref<1x8x128xf32, #tpu.memory_space<vmem>>, vector<1x8x128xf32>
    %8 = vector.shape_cast %7 : vector<1x8x128xf32> to vector<8x128xf32>
    %cst = arith.constant dense<0.000000e+00> : vector<6x128xf32>
    %9 = tpu.matmul %6, %8, %cst {dimension_numbers = #tpu.dot_dimension_numbers<[0], [0], [1], [1], [0, 1, 1, 1], [], []>, precision = #tpu.contract_precision<fp32>} : vector<8x6xf32>, vector<8x128xf32>, vector<6x128xf32> -> vector<6x128xf32>
    %c0_5 = arith.constant 0 : index
    %c0_6 = arith.constant 0 : index
    %c0_7 = arith.constant 0 : index
    %10 = vector.load %arg4[%c0_5, %c0_6, %c0_7] : memref<1x6x128xf32, #tpu.memory_space<vmem>>, vector<1x6x128xf32>
    %11 = vector.shape_cast %10 : vector<1x6x128xf32> to vector<6x128xf32>
    %12 = vector.shape_cast %9 : vector<6x128xf32> to vector<1x6x128xf32>
    tpu.vector_store %arg4[%c0_5, %c0_6, %c0_7], %12 {strides = array<i32>} : memref<1x6x128xf32, #tpu.memory_space<vmem>>, vector<1x6x128xf32>,
    return
  }
  func.func @transform_0(%arg0: i32, %arg1: i32) -> (i32, i32, i32) {
    %c0_i32 = arith.constant 0 : i32
    %c0_i32_0 = arith.constant 0 : i32
    return %arg0, %c0_i32, %arg1 : i32, i32, i32
  }
  func.func @transform_1(%arg0: i32, %arg1: i32) -> (i32, i32, i32) {
    %c0_i32 = arith.constant 0 : i32
    %c0_i32_0 = arith.constant 0 : i32
    %c0_i32_1 = arith.constant 0 : i32
    return %arg0, %c0_i32, %c0_i32_0 : i32, i32, i32
  }
  func.func @transform_2(%arg0: i32, %arg1: i32) -> (i32, i32, i32) {
    %c0_i32 = arith.constant 0 : i32
    %c0_i32_0 = arith.constant 0 : i32
    return %arg0, %arg1, %c0_i32 : i32, i32, i32
  }
}

</mosaic_0001>

<bundles_post_ra>
// kernel: tpu_custom_call.1
= control target key start
LH: loop header
LB: loop body
LE: loop exit
PB: predicated region body
PF: predicated region fallthrough
CT: control target
= control target key end

     0   :  { %7 = vsyncpa [#allocation3], 0  ;;  %s1248_s0 = inlined_call_operand.hbm [shape: s32[2,1,6], index: 0, kind: input, shape index: {}]   ;;  %s1249_s1 = inlined_call_operand.hbm [shape: f32[2,8,128], index: 1, kind: input, shape index: {}]   ;;  %s1250_s2 = inlined_call_operand.vmem [shape: f32[2,6,128], index: 2, kind: output, shape index: {}]  }
   0x1   :  { %9 = vsyncpa [#allocation3 + $0x1], 0 }
   0x2   :  { %10 = vsyncpa [#allocation5], 0 }
   0x3   :  { %12 = vsyncpa [#allocation5 + $0x1], 0  ;;  %s1076_s9 = smov 0   ;;  %s1078_s10 = smov 0  }
   0x4   :  { %s1080_s11 = smov 0   ;;  %s1082_s12 = smov 0  }
   0x5   :  { %s1084_s13 = smov 0   ;;  %s1086_s14 = smov 0  }
   0x6 LB: > { %s814_s15 = sadd.s32 4294967295, %s1055_s14   ;;  %s30_s16 = sadd.s32 1, %s1051_s13  ;;  %s1055_s14 = sphi %s1086_s14, %s18_s14   ;;  %s1051_s13 = sphi %s1084_s13, %s1264_s13   ;;  %s1047_s12 = sphi %s1082_s12, %s1263_s12   ;;  %s1043_s11 = sphi %s1080_s11, %s1262_s11   ;;  %s1039_s10 = sphi %s1078_s10, %s1261_s10   ;;  %s1035_s9 = sphi %s1076_s9, %s1260_s9  }
   0x7   : > { %p32_p0 = scmp.ge.s32.totalorder %s30_s16, 2  ;;  %s39_s17 = sadd.s32 1, %s1043_s11 }
   0x8   : > { %p46_p1 = scmp.ne.s32.totalorder %s1043_s11, %s1039_s10  ;;  %p47_p2 = scmp.eq.s32.totalorder %s1055_s14, 0 }
   0x9   : > { %s1266_s16 = smov (%p32_p0, %s30_s16), 0  ;;  %p52_p4 = scmp.ne.s32.totalorder %s1039_s10, %s1035_s9 }
   0xa   : > { %p1112_p3 = por %p47_p2, %p46_p1  ;;  %s34_s19 = ssub.s32 %s1051_s13, %s1266_s16 }
   0xb   : > { %p53_p5 = scmp.eq.s32.totalorder %s814_s15, 0  ;;  %p37_p6 = scmp.eq.s32.totalorder %s34_s19, 0 }
   0xc   : > { %p890_p8 = scmp.lt.s32.totalorder %s1055_s14, 2  ;;  %s1128_s22 = sand.u32 1, %s1043_s11  }
   0xd   : > { %p1119_p7 = por %p53_p5, %p52_p4  ;;  %s818_s23 = sshll.u32 %s1051_s13, 4 }
   0xe   : > { %s1125_s21 = scalar_select %p37_p6, %s1043_s11, %s39_s17  }
   0xf   : > { %s1253_s20 = scalar_select %p1119_p7, 1, 0 }
  0x10   : > { %s1134_s26 = scalar_lea.hbm %s1248_s0, %s818_s23  ;;  %s133_s27 = scalar_lea.vmem [#allocation2], %s1128_s22 }
  0x11   : > { %s141_s28 = sshll.u32 %s133_s27, 4  ;;  %p1141_p9 = pnand %p890_p8, %p1112_p3  ;;  %s1137_s28 = int_to_ptr.vmem [resolvable:$true] %s141_s28 }
  0x12   : > { %s131_s30 = scalar_lea.sflag [#allocation3], %s1128_s22  ;;  %s941_s3 = scalar_lea.hbm %s1134_s26, 16 }
  0x13   : > { %p942_p12 = scmp.ne.s32.totalorder %s1134_s26, %s941_s3  ;;  %p943_p13 = pneg %p1141_p9 }
  0x14   : > { %s946_s6 = scalar_lea.hbm %s1248_s0, 32  ;;  %p947_p2 = scmp.lt.u32.totalorder %s1134_s26, %s1248_s0 }
  0x15   : > { %p944_p0 = pnand %p943_p13, %p942_p12  ;;  %p948_p3 = scmp.lt.u32.totalorder %s946_s6, %s941_s3 }
  0x16   : > { %p950_p5 = scmp.lt.u32.totalorder %s941_s3, %s1134_s26 }
  0x17   : > { %p945_p1 = pneg %p944_p0  ;;  %p949_p4 = por %p948_p3, %p947_p2 }
  0x19   : > { %p951_p6 = por %p950_p5, %p949_p4 }
  0x1b   : > { %p952_p8 = pnand %p951_p6, %p945_p1 }
  0x1d   : > { %955 = shalt.err (!%p952_p8)
}
  0x1e   : > { %s956_s9 = scalar_lea.vmem %s1137_s28, 16  ;;  %s1057_s15 = smov [#allocation2]  }
  0x1f   : > { %p957_p12 = scmp.ne.s32.totalorder %s1137_s28, %s956_s9  ;;  %s961_s17 = sshll.u32 %s1057_s15, 4  ;;  %s962_s17 = int_to_ptr.vmem [resolvable:$false] %s961_s17 }
  0x20   : > { %s963_s18 = scalar_lea.vmem %s962_s17, 32  ;;  %p964_p11 = scmp.lt.s32.totalorder %s1137_s28, %s962_s17 }
  0x21   : > { %p959_p0 = pnand %p957_p12, %p943_p13  ;;  %p965_p2 = scmp.lt.s32.totalorder %s963_s18, %s956_s9 }
  0x23   : > { %p960_p10 = pneg %p959_p0  ;;  %p966_p3 = por %p965_p2, %p964_p11 }
  0x25   : > { %p967_p4 = pnand %p966_p3, %p960_p10 }
  0x27   : > { %970 = shalt.err (!%p967_p4)
}
  0x28   : > { %886 = dma.hbm_to_vmem [thread:$0]  (!%p1141_p9), %s1134_s26, 16, %s1137_s28, %s131_s30  }
  0x29   : > { %p1255_p1 = scmp.lt.s32.totalorder %s1055_s14, 3  ;;  %p1256_p5 = scmp.ge.s32.totalorder %s1055_s14, 1 }
  0x2a   : > { %s819_s23 = sshll.u32 %s1128_s22, 3  ;;  %s820_s24 = sshll.u32 %s1051_s13, 7 }
  0x2b   : > { %p1177_p6 = pnand %p1256_p5, %p1255_p1  ;;  %s1186_s3 = scalar_lea.hbm %s1249_s1, %s820_s24 }
  0x2c   : > { %s152_s4 = scalar_lea.vmem [#allocation4], %s819_s23  ;;  %s149_s26 = scalar_lea.sflag [#allocation5], %s1128_s22 }
  0x2d   : > { %s1257_s19 = scalar_select %p1177_p6, 1, 0 }
  0x2e   : > { %s159_s5 = sshll.u32 %s152_s4, 4  ;;  %s971_s28 = scalar_lea.hbm %s1186_s3, 128  ;;  %s160_s5 = int_to_ptr.vmem [resolvable:$true] %s159_s5 }
  0x2f   : > { %p972_p10 = scmp.ne.s32.totalorder %s1186_s3, %s971_s28  ;;  %s976_s7 = scalar_lea.hbm %s1249_s1, 256 }
  0x30   : > { %p977_p12 = scmp.lt.u32.totalorder %s1186_s3, %s1249_s1  ;;  %p978_p0 = scmp.lt.u32.totalorder %s976_s7, %s971_s28 }
  0x31   : > { %p974_p11 = pnand %p972_p10, %p943_p13  ;;  %p980_p3 = scmp.lt.u32.totalorder %s971_s28, %s1186_s3 }
  0x32   : > { %p979_p2 = por %p978_p0, %p977_p12 }
  0x33   : > { %p975_p8 = pneg %p974_p11 }
  0x34   : > { %p981_p4 = por %p980_p3, %p979_p2 }
  0x36   : > { %p982_p1 = pnand %p981_p4, %p975_p8 }
  0x38   : > { %985 = shalt.err (!%p982_p1)
}
  0x39   : > { %s986_s22 = scalar_lea.vmem %s160_s5, 128  ;;  %s1058_s15 = smov [#allocation4]  }
  0x3a   : > { %p987_p5 = scmp.ne.s32.totalorder %s160_s5, %s986_s22  ;;  %s991_s17 = sshll.u32 %s1058_s15, 4  ;;  %s992_s17 = int_to_ptr.vmem [resolvable:$false] %s991_s17 }
  0x3b   : > { %s993_s18 = scalar_lea.vmem %s992_s17, 256  ;;  %p994_p7 = scmp.lt.s32.totalorder %s160_s5, %s992_s17 }
  0x3c   : > { %p989_p10 = pnand %p987_p5, %p943_p13  ;;  %p995_p6 = scmp.lt.s32.totalorder %s993_s18, %s986_s22 }
  0x3e   : > { %p990_p11 = pneg %p989_p10  ;;  %p996_p0 = por %p995_p6, %p994_p7 }
  0x40   : > { %p997_p12 = pnand %p996_p0, %p990_p11 }
  0x42   : > { %1000 = shalt.err (!%p997_p12)
}
  0x43   : > { %889 = dma.hbm_to_vmem [thread:$0]  (!%p1141_p9), %s1186_s3, 128, %s160_s5, %s149_s26  }
  0x44   : > { %p1258_p8 = scmp.ne.s32.totalorder %s1257_s19, 0 }
  0x45   : > { %s170_s23 = sand.u32 (!%p1258_p8), 1, %s1039_s10   ;;  %p1259_p13 = scmp.ne.s32.totalorder (!%p1258_p8), %s1253_s20, 0 }
  0x46   : > { %168 = sbr.rel (%p1258_p8) target bundleno = 458 (0x1ca), region = 28  ;;  %s171_s24 = scalar_lea.sflag (!%p1258_p8), [#allocation3], %s170_s23 }
  0x47   : > { %s173_s25 = scalar_lea.vmem (!%p1258_p8), [#allocation2], %s170_s23 }
  0x4d   : > { %1026 = dma.done.wait (%p1259_p13), %s171_s24, 16  }
  0x4e   : > { %1028 = vsyncadd (%p1259_p13), %s171_s24, 4294967280  ;;  %s822_s27 = sshll.u32 %s170_s23, 3  ;;  %s179_s4 = scalar_lea.sflag [#allocation5], %s170_s23 }
  0x4f   : > { %s182_s28 = scalar_lea.vmem [#allocation4], %s822_s27 }
  0x50   : > { %1030 = dma.done.wait (%p1259_p13), %s179_s4, 128  }
  0x51   : > { %1032 = vsyncadd (%p1259_p13), %s179_s4, 4294967168  ;;  %v217_v0 = vlaneseq  ;;  %v1059_v1 = vmov 0.0   ;;  %v824_v3 = vld [vmem:[%s173_s25] ss:$0 sm:$0xff]  ;;  %v226_v5 = vld [vmem:[%s182_s28] sm:$0xff]  ;;  %vm1060_vm1 = vmmov 0  }
  0x52   : > { %855 = vmatprep.subr.mxu0 %v1059_v1  ;;  %840 = vmatprep.subr.mxu1 %v1059_v1  ;;  %v264_v6 = vand.u32 4294901760, %v226_v5  ;;  %vm259_vm2 = vcmask 64512   ;;  %p209_p7 = scmp.lt.s32.totalorder %s1047_s12, 1 }
  0x53   : > { %v218_v2 = vshrl.u32 %v217_v0, 7  ;;  %857 = vmatprep.mubr.msk.f32.mxu0 %vm1060_vm1, %v1059_v1  ;;  %842 = vmatprep.mubr.msk.f32.mxu1 %vm1060_vm1, %v1059_v1 }
  0x54   : > { %856 = vmatpush3.msra.mxu0 %v264_v6  ;;  %841 = vmatpush3.msra.mxu1 %v264_v6  ;;  %v341_v7 = vsub.f32 %v226_v5, %v264_v6  ;;  %s1268_s12 = smov (!%p209_p7, %s1047_s12), 1 }
  0x55   : > { %vm223_vm0 = vcmp.eq.s32.totalorder %v218_v2, %v824_v3  ;;  %845 = vmatprep.subr.mxu1 %v1059_v1  ;;  %860 = vmatprep.subr.mxu0 %v1059_v1  ;;  %s823_s20 = sshll.u32 %s1268_s12, 3 }
  0x56   : > { %v825_v4 = vsel %vm223_vm0, 1.0, %v1059_v1  ;;  %v342_v10 = vand.u32 4294901760, %v341_v7  ;;  %s215_s3 = scalar_lea.vmem %s1250_s2, %s823_s20 }
  0x57   : > { %227 = vxpose.xlu0.b32.start.end [1/1] (short) (narrow) %v825_v4, 8 }
  0x58   : > { %v343_v13 = vsub.f32 %v341_v7, %v342_v10 }
  0x5a   : > { %v344_v16 = vand.u32 4294901760, %v343_v13 }
  0xd7   : > { %v243_v8 = vpop.trf.xlu0 }
  0xd8   : > { %v261_v9 = vsel %vm259_vm2, %v243_v8, 0 }
  0xd9   : > { %v329_v11 = vand.u32 4294901760, %v261_v9 }
  0xdb   : > { %v330_v12 = vsub.f32 %v261_v9, %v329_v11 }
  0xdd   : > { %v331_v14 = vand.u32 4294901760, %v330_v12 }
  0xdf   : > { %858 = vmatmul.mubr.f32.vlgmr.msra.gmra.mrb[0].mxu0 %v331_v14  ;;  %v332_v15 = vsub.f32 %v330_v12, %v331_v14 }
  0xe0   : > { %861 = vmatpush3.msra.mxu0 %v342_v10  ;;  %862 = vmatprep.mubr.msk.f32.mxu0 %vm1060_vm1, %v1059_v1 }
  0xe1   : > { %v333_v17 = vand.u32 4294901760, %v332_v15  ;;  %865 = vmatprep.subr.mxu0 %v1059_v1 }
  0xe3   : > { %843 = vmatmul.mubr.f32.vlgmr.msra.gmra.mrb[0].mxu1 %v333_v17 }
  0xe4   : > { %846 = vmatpush3.msra.mxu1 %v344_v16  ;;  %847 = vmatprep.mubr.msk.f32.mxu1 %vm1060_vm1, %v1059_v1 }
  0xe5   : > { %850 = vmatprep.subr.mxu1 %v1059_v1 }
  0xe7   : > { %863 = vmatmul.mubr.f32.vlgmr.msra.gmra.mrb[0].mxu0 %v329_v11 }
  0xe8   : > { %866 = vmatpush3.msra.mxu0 %v264_v6  ;;  %867 = vmatprep.mubr.msk.f32.mxu0 %vm1060_vm1, %v1059_v1 }
  0xeb   : > { %848 = vmatmul.mubr.f32.vlgmr.msra.gmra.mrb[0].mxu1 %v329_v11 }
  0xec   : > { %851 = vmatpush3.msra.mxu1 %v341_v7  ;;  %852 = vmatprep.mubr.msk.f32.mxu1 %vm1060_vm1, %v1059_v1 }
  0xef   : > { %868 = vmatmul.mubr.f32.vlgmr.msra.gmra.mrb[0].mxu0 %v329_v11 }
  0xf3   : > { %853 = vmatmul.mubr.f32.vlgmr.msra.gmra.mrb[0].mxu1 %v330_v12 }
 0x1c2   : > { %v705_v18 = vpop.f32.mrb[0].mxu0 }
 0x1c3   : > { %v869_v19 = vpop.f32.mrb[1].mxu0 }
 0x1c6   : > { %v485_v20 = vpop.f32.mrb[0].mxu1 }
 0x1c7   : > { %v870_v21 = vadd.f32 %v705_v18, %v485_v20  ;;  %v854_v22 = vpop.f32.mrb[1].mxu1 }
 0x1c9   : > { %709 = vst [vmem:[%s215_s3] sm:$0x3f] %v870_v21 }
 0x1ca PF: > { %s18_s14 = sadd.s32 1, %s1055_s14   ;;  %s1260_s9 = smov %s1039_s10 }
 0x1cb   : > { %p15_p9 = scmp.ge.s32.totalorder %s18_s14, 4   ;;  %s1261_s10 = smov %s1043_s11 }
 0x1cc   : > { %s1262_s11 = smov %s1125_s21  ;;  %s1263_s12 = smov %s1051_s13 }
 0x1cd   : > { %s1264_s13 = smov %s1266_s16  ;;  %17 = sbr.rel (!%p15_p9) target bundleno = 6 (0x6), region = 81 }
 0x1d4   :  { %735 = vsyncpa [#allocation3], 1 }
 0x1d5   :  { %737 = vsyncpa [#allocation3 + $0x1], 1 }
 0x1d6   :  { %738 = vsyncpa [#allocation5], 1 }
 0x1d7   :  { %740 = vsyncpa [#allocation5 + $0x1], 1 }

</bundles_post_ra>
